<compile_context>
chip_gen: v7x
topology: tpu7x:2x2x1
jax: 0.10.0
libtpu: 0.0.40
codegen_flags: <defaults>
</compile_context>

<pallas_src>
import jax
import jax.numpy as jnp
from jax.experimental import pallas as pl
from jax.experimental.pallas import tpu as pltpu

TOKEN_COUNT_MEAN = 125.33427716479422
TOKEN_COUNT_STD = 114.56433973046047


def _bert_classifier_kernel(tok_ref, vec_ref, w_cls_ref, w_tok_cls_ref,
                            b_fused_ref, out_ref):
    """One batch tile: out = vec @ W_cls_T + tok * w_tok_cls + b_fused."""
    # MXU: [TM, H] @ [H, Cp] with f32 accumulation.
    acc = jnp.dot(vec_ref[...], w_cls_ref[...],
                  preferred_element_type=jnp.float32)
    # Folded token-length branch: rank-1 f32 correction (VPU).
    acc = acc + tok_ref[...] * w_tok_cls_ref[...] + b_fused_ref[...]
    out_ref[...] = acc.astype(out_ref.dtype)


def prepare_params(w_tok, b_tok, w_cls, b_cls, *, matmul_dtype=jnp.float32):
    """Fold the token-count branch through the classifier, transpose W_cls and
    lane-pad the C dimension to a multiple of 128. Call once at init time."""
    C, H = w_cls.shape
    Cp = ((C + 127) // 128) * 128

    w_cls_t = jnp.transpose(w_cls).astype(jnp.float32)            # [H, C]
    inv_std = jnp.float32(1.0 / TOKEN_COUNT_STD)

    # out = vec0 @ Wt + tok*((w_tok/std) @ Wt) + ((b_tok - mean/std*w_tok) @ Wt + b_cls)
    w_tok_cls = (w_tok.astype(jnp.float32) * inv_std) @ w_cls_t               # [C]
    b_fused = ((b_tok.astype(jnp.float32)
                - (TOKEN_COUNT_MEAN * inv_std) * w_tok.astype(jnp.float32))
               @ w_cls_t) + b_cls.astype(jnp.float32)                         # [C]

    def _pad_row(v):
        return jnp.pad(v.reshape(1, C).astype(jnp.float32), ((0, 0), (0, Cp - C)))

    return {
        "w_cls_t": jnp.pad(w_cls_t, ((0, 0), (0, Cp - C))).astype(matmul_dtype),
        "w_tok_cls": _pad_row(w_tok_cls),     # f32 (keeps v5e off bf16 VPU)
        "b_fused": _pad_row(b_fused),         # f32
        "num_class": C,
        "matmul_dtype": matmul_dtype,
    }


def bert_classifier_fwd(vec_0, token_lens, params, *, block_rows=512):
    """vec_0: [B, H]; token_lens: [B]; params from prepare_params."""
    B, H = vec_0.shape
    Cp = params["w_cls_t"].shape[1]
    C = params["num_class"]
    dt = params["matmul_dtype"]

    # Row-tile sized for pipelining; fall back to a single full block for tiny B.
    TM = block_rows if B >= block_rows else B
    grid = (pl.cdiv(B, TM),)

    tok2d = token_lens.reshape(B, 1).astype(jnp.float32)  # raw counts; scale folded
    vec = vec_0.astype(dt)

    out_padded = pl.pallas_call(
        _bert_classifier_kernel,
        out_shape=jax.ShapeDtypeStruct((B, Cp), jnp.float32),
        grid=grid,
        in_specs=[
            pl.BlockSpec((TM, 1), lambda i: (i, 0)),     # token counts (per tile)
            pl.BlockSpec((TM, H), lambda i: (i, 0)),     # vec_0 tile (pipelined)
            pl.BlockSpec((H, Cp), lambda i: (0, 0)),     # W_cls^T  (resident)
            pl.BlockSpec((1, Cp), lambda i: (0, 0)),     # w_tok_cls (resident)
            pl.BlockSpec((1, Cp), lambda i: (0, 0)),     # b_fused   (resident)
        ],
        out_specs=pl.BlockSpec((TM, Cp), lambda i: (i, 0)),
        compiler_params=pltpu.CompilerParams(
            dimension_semantics=("parallel",),           # v7x: shard rows over 2 TCs
            vmem_limit_bytes=64 * 1024 * 1024,
        ),
    )(tok2d, vec, params["w_cls_t"], params["w_tok_cls"], params["b_fused"])

    return out_padded[:, :C]                             # drop lane padding


def reference(vec_0, token_lens, w_tok, b_tok, w_cls, b_cls):
    t = (token_lens - TOKEN_COUNT_MEAN) / TOKEN_COUNT_STD
    out_len = t[:, None] * w_tok[None, :] + b_tok[None, :]
    vec = vec_0 + out_len
    return vec @ w_cls.T + b_cls[None, :]


if __name__ == "__main__":
    B, H, C = 8, 32, 4   # batch, hidden_size, num_class

    key = jax.random.PRNGKey(0)
    k0, k1, k2, k3, k4, k5 = jax.random.split(key, 6)

    # deterministic synthetic parameters (mirrors the module's init semantics)
    w_cls = 0.02 * jax.random.normal(k0, (C, H), jnp.float32)   # cls.weight, std=0.02
    b_cls = jax.random.normal(k1, (C,), jnp.float32)            # cls.bias
    w_tok = jax.random.normal(k2, (H,), jnp.float32)            # fc_token_len.weight (in=1)
    b_tok = jax.random.normal(k3, (H,), jnp.float32)            # fc_token_len.bias

    # inputs
    vec_0 = jax.random.normal(k4, (B, H), jnp.float32)
    token_lens = jax.random.uniform(k5, (B,), jnp.float32, 0.0, 1058.0)

    ref = reference(vec_0, token_lens, w_tok, b_tok, w_cls, b_cls)

    # f32 matmul path: tight tolerance against the reference.
    params_f32 = prepare_params(w_tok, b_tok, w_cls, b_cls, matmul_dtype=jnp.float32)
    out_f32 = jax.block_until_ready(bert_classifier_fwd(vec_0, token_lens, params_f32))
    assert out_f32.shape == (B, C)
    assert jnp.allclose(out_f32, ref, atol=1e-4, rtol=1e-4)

    # bf16 matmul path (preferred on v6e/v7x: halves HBM bytes / VMEM footprint).
    params_bf16 = prepare_params(w_tok, b_tok, w_cls, b_cls, matmul_dtype=jnp.bfloat16)
    out_bf16 = jax.block_until_ready(bert_classifier_fwd(vec_0, token_lens, params_bf16))
    assert out_bf16.shape == (B, C)
    assert jnp.allclose(out_bf16, ref, atol=2e-2, rtol=2e-2)

    print("KERNEL_OK")
</pallas_src>

<mosaic_0001>
module attributes {stable_mosaic.version = 11 : i64} {
  func.func @_bert_classifier_kernel(%arg0: i32, %arg1: memref<8x1xf32, #tpu.memory_space<vmem>>, %arg2: memref<8x32xf32, #tpu.memory_space<vmem>>, %arg3: memref<32x128xf32, #tpu.memory_space<vmem>>, %arg4: memref<1x128xf32, #tpu.memory_space<vmem>>, %arg5: memref<1x128xf32, #tpu.memory_space<vmem>>, %arg6: memref<8x128xf32, #tpu.memory_space<vmem>>) attributes {dimension_semantics = [#tpu.dimension_semantics<parallel>], iteration_bounds = array<i64: 1>, scalar_prefetch = 0 : i64, scratch_operands = 0 : i64, tpu.core_type = #tpu.core_type<tc>, window_params = [{transform_indices = @transform_0, window_bounds = array<i64: 8, 1>}, {transform_indices = @transform_1, window_bounds = array<i64: 8, 32>}, {pipeline_mode = #tpu.pipeline_mode<synchronous>, transform_indices = @transform_2, window_bounds = array<i64: 32, 128>}, {pipeline_mode = #tpu.pipeline_mode<synchronous>, transform_indices = @transform_3, window_bounds = array<i64: 1, 128>}, {pipeline_mode = #tpu.pipeline_mode<synchronous>, transform_indices = @transform_4, window_bounds = array<i64: 1, 128>}, {transform_indices = @transform_5, window_bounds = array<i64: 8, 128>}]} {
    %c0 = arith.constant 0 : index
    %c0_0 = arith.constant 0 : index
    %0 = vector.load %arg2[%c0, %c0_0] : memref<8x32xf32, #tpu.memory_space<vmem>>, vector<8x32xf32>
    %c0_1 = arith.constant 0 : index
    %c0_2 = arith.constant 0 : index
    %1 = vector.load %arg3[%c0_1, %c0_2] : memref<32x128xf32, #tpu.memory_space<vmem>>, vector<32x128xf32>
    %cst = arith.constant dense<0.000000e+00> : vector<8x128xf32>
    %2 = tpu.matmul %0, %1, %cst {dimension_numbers = #tpu.dot_dimension_numbers<[1], [0], [0], [1], [0, 0, 1, 1], [], []>} : vector<8x32xf32>, vector<32x128xf32>, vector<8x128xf32> -> vector<8x128xf32>
    %c0_3 = arith.constant 0 : index
    %c0_4 = arith.constant 0 : index
    %3 = vector.load %arg1[%c0_3, %c0_4] : memref<8x1xf32, #tpu.memory_space<vmem>>, vector<8x1xf32>
    %c0_5 = arith.constant 0 : index
    %c0_6 = arith.constant 0 : index
    %4 = vector.load %arg4[%c0_5, %c0_6] : memref<1x128xf32, #tpu.memory_space<vmem>>, vector<1x128xf32>
    %5 = vector.broadcast %3 : vector<8x1xf32> to vector<8x128xf32>
    %6 = vector.broadcast %4 : vector<1x128xf32> to vector<8x128xf32>
    %7 = arith.mulf %5, %6 : vector<8x128xf32>
    %8 = arith.addf %2, %7 : vector<8x128xf32>
    %c0_7 = arith.constant 0 : index
    %c0_8 = arith.constant 0 : index
    %9 = vector.load %arg5[%c0_7, %c0_8] : memref<1x128xf32, #tpu.memory_space<vmem>>, vector<1x128xf32>
    %10 = vector.broadcast %9 : vector<1x128xf32> to vector<8x128xf32>
    %11 = arith.addf %8, %10 : vector<8x128xf32>
    %c0_9 = arith.constant 0 : index
    %c0_10 = arith.constant 0 : index
    %12 = vector.load %arg6[%c0_9, %c0_10] : memref<8x128xf32, #tpu.memory_space<vmem>>, vector<8x128xf32>
    tpu.vector_store %arg6[%c0_9, %c0_10], %11 {strides = array<i32>} : memref<8x128xf32, #tpu.memory_space<vmem>>, vector<8x128xf32>,
    return
  }
  func.func @transform_0(%arg0: i32) -> (i32, i32) {
    %c0_i32 = arith.constant 0 : i32
    %c0_i32_0 = arith.constant 0 : i32
    return %arg0, %c0_i32 : i32, i32
  }
  func.func @transform_1(%arg0: i32) -> (i32, i32) {
    %c0_i32 = arith.constant 0 : i32
    %c0_i32_0 = arith.constant 0 : i32
    return %arg0, %c0_i32 : i32, i32
  }
  func.func @transform_2(%arg0: i32) -> (i32, i32) {
    %c0_i32 = arith.constant 0 : i32
    %c0_i32_0 = arith.constant 0 : i32
    %c0_i32_1 = arith.constant 0 : i32
    return %c0_i32, %c0_i32_0 : i32, i32
  }
  func.func @transform_3(%arg0: i32) -> (i32, i32) {
    %c0_i32 = arith.constant 0 : i32
    %c0_i32_0 = arith.constant 0 : i32
    %c0_i32_1 = arith.constant 0 : i32
    return %c0_i32, %c0_i32_0 : i32, i32
  }
  func.func @transform_4(%arg0: i32) -> (i32, i32) {
    %c0_i32 = arith.constant 0 : i32
    %c0_i32_0 = arith.constant 0 : i32
    %c0_i32_1 = arith.constant 0 : i32
    return %c0_i32, %c0_i32_0 : i32, i32
  }
  func.func @transform_5(%arg0: i32) -> (i32, i32) {
    %c0_i32 = arith.constant 0 : i32
    %c0_i32_0 = arith.constant 0 : i32
    return %arg0, %c0_i32 : i32, i32
  }
}

</mosaic_0001>

<bundles_post_ra>
// kernel: tpu_custom_call.1
= control target key start
LH: loop header
LB: loop body
LE: loop exit
PB: predicated region body
PF: predicated region fallthrough
CT: control target
= control target key end

     0   :  { %10 = vsyncpa [#allocation3], 0  ;;  %s499_s0 = inlined_call_operand.hbm [shape: f32[8,1], index: 0, kind: input, shape index: {}]   ;;  %s500_s1 = inlined_call_operand.hbm [shape: f32[8,32], index: 1, kind: input, shape index: {}]   ;;  %s501_s2 = inlined_call_operand.hbm [shape: f32[32,128], index: 2, kind: input, shape index: {}]   ;;  %s502_s3 = inlined_call_operand.hbm [shape: f32[1,128], index: 3, kind: input, shape index: {}]   ;;  %s503_s4 = inlined_call_operand.hbm [shape: f32[1,128], index: 4, kind: input, shape index: {}]   ;;  %s504_s5 = inlined_call_operand.hbm [shape: f32[8,128], index: 5, kind: output, shape index: {}]  }
   0x1   :  { %11 = vsyncpa [#allocation6], 0 }
   0x2   :  { %12 = vsyncpa [#allocation9], 0 }
   0x3   :  { %13 = vsyncpa [#allocation4], 0  ;;  %s378_s18 = smov [#allocation5]   ;;  %s379_s20 = smov [#allocation8]  }
   0x4   :  { %s30_s19 = sshll.u32 %s378_s18, 4  ;;  %s52_s21 = sshll.u32 %s379_s20, 4  ;;  %s31_s19 = int_to_ptr.vmem [resolvable:$true] %s30_s19  ;;  %s53_s21 = int_to_ptr.vmem [resolvable:$true] %s52_s21 }
   0x5   :  { %s238_s24 = scalar_lea.hbm %s500_s1, 128 }
   0x6   :  { %p239_p0 = scmp.ne.s32.totalorder %s500_s1, %s238_s24  ;;  %p242_p1 = scmp.lt.u32.totalorder %s238_s24, %s500_s1 }
   0x8   :  { %p244_p2 = pnand %p242_p1, %p239_p0 }
   0xa   :  { %247 = shalt.err (!%p244_p2)
}
   0xb   :  { %s248_s29 = scalar_lea.vmem %s31_s19, 128  ;;  %p253_p4 = scmp.lt.s32.totalorder %s31_s19, %s31_s19 }
   0xc   :  { %p249_p3 = scmp.ne.s32.totalorder %s31_s19, %s248_s29  ;;  %p254_p5 = scmp.lt.s32.totalorder %s248_s29, %s248_s29 }
   0xe   :  { %p255_p6 = por %p254_p5, %p253_p4 }
  0x10   :  { %p256_p7 = pnand %p255_p6, %p249_p3 }
  0x12   :  { %259 = shalt.err (!%p256_p7)
}
  0x13   :  { %33 = dma.hbm_to_vmem [thread:$0]  %s500_s1, 128, %s31_s19, [#allocation6]  }
  0x14   :  { %s260_s9 = scalar_lea.hbm %s502_s3, 16 }
  0x15   :  { %p261_p8 = scmp.ne.s32.totalorder %s502_s3, %s260_s9  ;;  %p264_p9 = scmp.lt.u32.totalorder %s260_s9, %s502_s3 }
  0x17   :  { %p266_p10 = pnand %p264_p9, %p261_p8 }
  0x19   :  { %269 = shalt.err (!%p266_p10)
}
  0x1a   :  { %s270_s14 = scalar_lea.vmem %s53_s21, 16  ;;  %s274_s15 = scalar_lea.vmem %s53_s21, 32 }
  0x1b   :  { %p271_p11 = scmp.ne.s32.totalorder %s53_s21, %s270_s14  ;;  %p275_p12 = scmp.lt.s32.totalorder %s53_s21, %s53_s21 }
  0x1c   :  { %p276_p13 = scmp.lt.s32.totalorder %s274_s15, %s270_s14 }
  0x1e   :  { %p277_p0 = por %p276_p13, %p275_p12 }
  0x20   :  { %p278_p1 = pnand %p277_p0, %p271_p11 }
  0x22   :  { %281 = shalt.err (!%p278_p1)
}
  0x23   :  { %55 = dma.hbm_to_vmem [thread:$0]  %s502_s3, 16, %s53_s21, [#allocation9]  }
  0x24   :  { %s380_s17 = smov [#allocation2]   ;;  %s381_s19 = smov [#allocation7]  }
  0x25   :  { %s20_s18 = sshll.u32 %s380_s17, 4  ;;  %s39_s20 = sshll.u32 %s381_s19, 4  ;;  %s21_s18 = int_to_ptr.vmem [resolvable:$true] %s20_s18  ;;  %s444_s20 = int_to_ptr.vmem [resolvable:$true] %s39_s20 }
  0x26   :  { %s282_s24 = scalar_lea.hbm %s499_s0, 128 }
  0x27   :  { %p283_p2 = scmp.ne.s32.totalorder %s499_s0, %s282_s24  ;;  %p286_p3 = scmp.lt.u32.totalorder %s282_s24, %s499_s0 }
  0x29   :  { %p288_p4 = pnand %p286_p3, %p283_p2 }
  0x2b   :  { %291 = shalt.err (!%p288_p4)
}
  0x2c   :  { %s292_s3 = scalar_lea.vmem %s21_s18, 128  ;;  %p297_p6 = scmp.lt.s32.totalorder %s21_s18, %s21_s18 }
  0x2d   :  { %p293_p5 = scmp.ne.s32.totalorder %s21_s18, %s292_s3  ;;  %p298_p7 = scmp.lt.s32.totalorder %s292_s3, %s292_s3 }
  0x2f   :  { %p299_p8 = por %p298_p7, %p297_p6 }
  0x31   :  { %p300_p9 = pnand %p299_p8, %p293_p5 }
  0x33   :  { %303 = shalt.err (!%p300_p9)
}
  0x34   :  { %23 = dma.hbm_to_vmem [thread:$0]  %s499_s0, 128, %s21_s18, [#allocation3]  }
  0x35   :  { %s304_s7 = scalar_lea.hbm %s501_s2, 512 }
  0x36   :  { %p305_p10 = scmp.ne.s32.totalorder %s501_s2, %s304_s7  ;;  %p308_p11 = scmp.lt.u32.totalorder %s304_s7, %s501_s2 }
  0x38   :  { %p310_p12 = pnand %p308_p11, %p305_p10 }
  0x3a   :  { %313 = shalt.err (!%p310_p12)
}
  0x3b   :  { %s314_s12 = scalar_lea.vmem %s444_s20, 512  ;;  %p319_p0 = scmp.lt.s32.totalorder %s444_s20, %s444_s20 }
  0x3c   :  { %p315_p13 = scmp.ne.s32.totalorder %s444_s20, %s314_s12  ;;  %p320_p1 = scmp.lt.s32.totalorder %s314_s12, %s314_s12 }
  0x3e   :  { %p321_p2 = por %p320_p1, %p319_p0 }
  0x40   :  { %p322_p3 = pnand %p321_p2, %p315_p13 }
  0x42   :  { %325 = shalt.err (!%p322_p3)
}
  0x43   :  { %s382_s0 = smov 128   ;;  %s383_s13 = smov 8  }
  0x44   :  { %45 = dma.hbm_to_vmem [thread:$0]  %s501_s2, 512, %s444_s20, [#allocation6], %s382_s0, %s382_s0, %s383_s13  }
  0x45   :  { %s384_s1 = smov [#allocation10]   ;;  %s326_s19 = scalar_lea.hbm %s503_s4, 16 }
  0x46   :  { %s62_s16 = sshll.u32 %s384_s1, 4  ;;  %p327_p4 = scmp.ne.s32.totalorder %s503_s4, %s326_s19  ;;  %s63_s16 = int_to_ptr.vmem [resolvable:$true] %s62_s16 }
  0x47   :  { %p330_p5 = scmp.lt.u32.totalorder %s326_s19, %s503_s4 }
  0x49   :  { %p332_p6 = pnand %p330_p5, %p327_p4 }
  0x4b   :  { %335 = shalt.err (!%p332_p6)
}
  0x4c   :  { %s336_s26 = scalar_lea.vmem %s63_s16, 16  ;;  %s340_s2 = scalar_lea.vmem %s63_s16, 32 }
  0x4d   :  { %p337_p7 = scmp.ne.s32.totalorder %s63_s16, %s336_s26  ;;  %p341_p8 = scmp.lt.s32.totalorder %s63_s16, %s63_s16 }
  0x4e   :  { %p342_p9 = scmp.lt.s32.totalorder %s340_s2, %s336_s26 }
  0x50   :  { %p343_p10 = por %p342_p9, %p341_p8 }
  0x52   :  { %p344_p11 = pnand %p343_p10, %p337_p7 }
  0x54   :  { %347 = shalt.err (!%p344_p11)
}
  0x55   :  { %65 = dma.hbm_to_vmem [thread:$0]  %s503_s4, 16, %s63_s16, [#allocation9]  }
  0x56   :  { %370 = dma.done.wait [#allocation3], 128  }
  0x57   :  { %371 = vsyncadd [#allocation3], 4294967168 }
  0x58   :  { %372 = dma.done.wait [#allocation6], 640  }
  0x59   :  { %373 = vsyncadd [#allocation6], 4294966656 }
  0x5a   :  { %374 = dma.done.wait [#allocation9], 32  }
  0x5b   :  { %375 = vsyncadd [#allocation9], 4294967264  ;;  %v385_v0 = vmov 0.0|0.0   ;;  %vm386_vm0 = vmmov 0   ;;  %v387_v1 = vmov 0.0   ;;  %v388_v2 = vmov 0  }
  0x5c   :  { %219 = vmatprep.subr.bf16.mxu0 %v385_v0  ;;  %216 = vmatprep.mubr.msk.f32.mxu0 %vm386_vm0, %v387_v1  ;;  %v82_v3 = vld [vmem:[#allocation7] sm:$0xff]  ;;  %v83_v4 = vld [vmem:[#allocation7 + $0x8] sm:$0xff]  ;;  %v84_v5 = vld [vmem:[#allocation7 + $0x10] sm:$0xff]  ;;  %vm100_vm1 = vcmask 261120   ;;  %s389_s4 = smov [#allocation11]  }
  0x5d   :  { %237 = vset.pattern.permute.xlu0 %v388_v2  ;;  %v220_v6 = vpack.c.bf16 %v83_v4, %v82_v3  ;;  %v85_v7 = vld [vmem:[#allocation7 + $0x18] sm:$0xff]  ;;  %v86_v8 = vld [vmem:[#allocation2] sm:$0xff]  ;;  %v200_v11 = vld [vmem:[#allocation8] ss:$0 sm:$0xff]  ;;  %s189_s28 = sshll.u32 %s389_s4, 4  ;;  %s190_s28 = int_to_ptr.vmem [resolvable:$true] %s189_s28 }
  0x5e   :  { %90 = vperm.xlu0 %237, %v86_v8   ;;  %v223_v9 = vpack.c.bf16 %v85_v7, %v84_v5  ;;  %v81_v10 = vld [vmem:[#allocation5] sm:$0xff]  ;;  %v202_v15 = vld [vmem:[#allocation10] ss:$0 sm:$0xff]  ;;  %s348_s3 = scalar_lea.vmem %s190_s28, 128  ;;  %p353_p13 = scmp.lt.s32.totalorder %s190_s28, %s190_s28 }
  0x5f   :  { %221 = vmatpush3.bf16.msra.mxu0 %v220_v6  ;;  %p349_p12 = scmp.ne.s32.totalorder %s190_s28, %s348_s3  ;;  %p354_p0 = scmp.lt.s32.totalorder %s348_s3, %s348_s3 }
  0x60   :  { %222 = vmatprep.subr.bf16.mxu0 %v385_v0 }
  0x61   :  { %p355_p1 = por %p354_p0, %p353_p13 }
  0x63   :  { %224 = vmatpush3.bf16.msra.mxu0 %v223_v9  ;;  %p356_p2 = pnand %p355_p1, %p349_p12 }
  0x66   :  { %217 = vmatmul.mubr.msk.f32.vlgmr.msra.gmra.mrb[0].mxu0 %vm100_vm1, %v81_v10 }
  0xdd   :  { %v91_v12 = vpop.permute.xlu0 %90 }
  0xde   :  { %v99_v13 = vmul.f32 %v200_v11, %v91_v12 }
 0x139   :  { %v170_v14 = vpop.f32.mrb[0].mxu0 }
 0x13a   :  { %v171_v16 = vadd.f32 %v170_v14, %v99_v13  ;;  %v218_v17 = vpop.f32.mrb[1].mxu0 }
 0x13c   :  { %v181_v18 = vadd.f32 %v202_v15, %v171_v16 }
 0x13e   :  { %182 = vst [vmem:[#allocation11] sm:$0xff] %v181_v18 }
 0x13f   :  { %359 = shalt.err (!%p356_p2)
}
 0x140   :  { %s360_s30 = scalar_lea.hbm %s504_s5, 128 }
 0x141   :  { %p361_p3 = scmp.ne.s32.totalorder %s504_s5, %s360_s30  ;;  %p364_p4 = scmp.lt.u32.totalorder %s360_s30, %s504_s5 }
 0x143   :  { %p366_p5 = pnand %p364_p4, %p361_p3 }
 0x145   :  { %369 = shalt.err (!%p366_p5)
}
 0x146   :  { %192 = dma.vmem_to_hbm [thread:$0]  %s190_s28, 128, %s504_s5, [#allocation4]  }
 0x147   :  { %376 = dma.done.wait [#allocation4], 128  }
 0x148   :  { %377 = vsyncadd [#allocation4], 4294967168 }
 0x149   :  { %196 = vsyncpa [#allocation3], 1 }
 0x14a   :  { %197 = vsyncpa [#allocation6], 1 }
 0x14b   :  { %198 = vsyncpa [#allocation9], 1 }
 0x14c   :  { %199 = vsyncpa [#allocation4], 1 }

</bundles_post_ra>
